<compile_context>
chip_gen: v7x
topology: tpu7x:2x2x1
jax: 0.10.0
libtpu: 0.0.40
codegen_flags: <defaults>
</compile_context>

<pallas_src>
import functools

import jax
import jax.numpy as jnp
from jax.experimental import pallas as pl
from jax.experimental.pallas import tpu as pltpu


def projection_kernel(x_ref, w_ref, b_ref, o_ref):
    # x_ref: (tm, D) row tile.  w_ref: (D, V) resident weight.  b_ref: (1, V).
    # Matmul in the incoming dtype (bf16-native on the MXU when callers pass
    # bf16), accumulate in f32.
    logits = jnp.dot(x_ref[...], w_ref[...], preferred_element_type=jnp.float32)
    logits = logits + b_ref[...].astype(jnp.float32)

    # Numerically-stable log_softmax along the vocab (lane) axis, in f32.
    m = jnp.max(logits, axis=-1, keepdims=True)
    shifted = logits - m
    lse = jnp.log(jnp.sum(jnp.exp(shifted), axis=-1, keepdims=True))
    o_ref[...] = (shifted - lse).astype(o_ref.dtype)


def _round_up(n, k):
    return ((n + k - 1) // k) * k


@functools.partial(jax.jit, static_argnames=("tm",))
def projection_layer(x, w, b, *, tm=256):
    """log_softmax(x @ w + b, axis=-1).

    x: (B, S, D);  w: (D, V) (== torch nn.Linear weight.T);  b: (V,)
    Returns (B, S, V).
    """
    B, S, D = x.shape
    V = w.shape[1]
    M = B * S

    # Row tile: multiple of 8 (sublane), no larger than the (padded) row count.
    tile_m = min(tm, _round_up(M, 8))
    M_pad = _round_up(M, tile_m)

    x2 = x.reshape(M, D)
    if M_pad != M:
        # Grid remainder: pad, compute, slice (padded rows discarded below).
        x2 = jnp.pad(x2, ((0, M_pad - M), (0, 0)))
    b2 = b.reshape(1, V)

    # VMEM budget: resident weight + bias, double-buffered x / out tiles.
    isz = jnp.dtype(x.dtype).itemsize
    wsz = jnp.dtype(w.dtype).itemsize
    vmem_need = (
        2 * tile_m * D * isz          # x tiles (double-buffered)
        + 2 * tile_m * V * isz        # output tiles (double-buffered)
        + (D * V + V) * wsz           # resident weight + bias
    )
    vmem_limit = int(min(max(2 * vmem_need, 32 << 20), 56 << 20))

    grid = (M_pad // tile_m,)
    out = pl.pallas_call(
        projection_kernel,
        out_shape=jax.ShapeDtypeStruct((M_pad, V), x.dtype),
        grid_spec=pltpu.PrefetchScalarGridSpec(
            num_scalar_prefetch=0,
            grid=grid,
            in_specs=[
                # Input row tile.
                pl.BlockSpec((tile_m, D), lambda i: (i, 0)),
                # Weight / bias: full, resident across the row grid.
                pl.BlockSpec((D, V), lambda i: (0, 0)),
                pl.BlockSpec((1, V), lambda i: (0, 0)),
            ],
            out_specs=pl.BlockSpec((tile_m, V), lambda i: (i, 0)),
        ),
        compiler_params=pltpu.CompilerParams(
            dimension_semantics=("parallel",),
            vmem_limit_bytes=vmem_limit,
        ),
    )(x2, w, b2)
    return out[:M].reshape(B, S, V)


def reference(x, w, b):
    """Pure-JAX reference (torch.log_softmax(Linear(x), dim=-1))."""
    logits = jnp.dot(x.astype(jnp.float32), w.astype(jnp.float32),
                     preferred_element_type=jnp.float32) + b.astype(jnp.float32)
    return jax.nn.log_softmax(logits, axis=-1).astype(x.dtype)


if __name__ == "__main__":
    key = jax.random.PRNGKey(0)
    kx, kw, kb, kx2 = jax.random.split(key, 4)

    # Small shapes consistent with the module: (batch, seq, d_model) -> vocab.
    B, S, D, V = 2, 8, 64, 128
    x = jax.random.normal(kx, (B, S, D), dtype=jnp.float32)
    # Deterministic Linear(d_model, vocab) parameters; w is torch weight.T.
    w = jax.random.normal(kw, (D, V), dtype=jnp.float32) * (1.0 / jnp.sqrt(D))
    b = jax.random.normal(kb, (V,), dtype=jnp.float32) * 0.02

    out = jax.block_until_ready(projection_layer(x, w, b))
    ref = reference(x, w, b)
    assert out.shape == (B, S, V)
    assert jnp.allclose(out, ref, atol=1e-3, rtol=1e-3), "mismatch vs reference"

    # Second shape exercising the grid-remainder (padding) path: M = 15 rows.
    B2, S2 = 3, 5
    x2 = jax.random.normal(kx2, (B2, S2, D), dtype=jnp.float32)
    out2 = jax.block_until_ready(projection_layer(x2, w, b))
    ref2 = reference(x2, w, b)
    assert out2.shape == (B2, S2, V)
    assert jnp.allclose(out2, ref2, atol=1e-3, rtol=1e-3), "mismatch (tail path)"

    print("KERNEL_OK")
</pallas_src>

<mosaic_0001>
module attributes {stable_mosaic.version = 11 : i64} {
  func.func @projection_kernel(%arg0: i32, %arg1: memref<16x64xf32, #tpu.memory_space<vmem>>, %arg2: memref<64x128xf32, #tpu.memory_space<vmem>>, %arg3: memref<1x128xf32, #tpu.memory_space<vmem>>, %arg4: memref<16x128xf32, #tpu.memory_space<vmem>>) attributes {dimension_semantics = [#tpu.dimension_semantics<parallel>], iteration_bounds = array<i64: 1>, scalar_prefetch = 0 : i64, scratch_operands = 0 : i64, tpu.core_type = #tpu.core_type<tc>, window_params = [{transform_indices = @transform_0, window_bounds = array<i64: 16, 64>}, {pipeline_mode = #tpu.pipeline_mode<synchronous>, transform_indices = @transform_1, window_bounds = array<i64: 64, 128>}, {pipeline_mode = #tpu.pipeline_mode<synchronous>, transform_indices = @transform_2, window_bounds = array<i64: 1, 128>}, {transform_indices = @transform_3, window_bounds = array<i64: 16, 128>}]} {
    %c0 = arith.constant 0 : index
    %c0_0 = arith.constant 0 : index
    %0 = vector.load %arg1[%c0, %c0_0] : memref<16x64xf32, #tpu.memory_space<vmem>>, vector<16x64xf32>
    %c0_1 = arith.constant 0 : index
    %c0_2 = arith.constant 0 : index
    %1 = vector.load %arg2[%c0_1, %c0_2] : memref<64x128xf32, #tpu.memory_space<vmem>>, vector<64x128xf32>
    %cst = arith.constant dense<0.000000e+00> : vector<16x128xf32>
    %2 = tpu.matmul %0, %1, %cst {dimension_numbers = #tpu.dot_dimension_numbers<[1], [0], [0], [1], [0, 0, 1, 1], [], []>} : vector<16x64xf32>, vector<64x128xf32>, vector<16x128xf32> -> vector<16x128xf32>
    %c0_3 = arith.constant 0 : index
    %c0_4 = arith.constant 0 : index
    %3 = vector.load %arg3[%c0_3, %c0_4] : memref<1x128xf32, #tpu.memory_space<vmem>>, vector<1x128xf32>
    %4 = vector.broadcast %3 : vector<1x128xf32> to vector<16x128xf32>
    %5 = arith.addf %2, %4 : vector<16x128xf32>
    %cst_5 = arith.constant dense<0xFF800000> : vector<16xf32>
    %6 = vector.multi_reduction <maximumf>, %5, %cst_5 [1] : vector<16x128xf32> to vector<16xf32>
    %7 = vector.shape_cast %6 : vector<16xf32> to vector<16x1xf32>
    %8 = vector.broadcast %7 : vector<16x1xf32> to vector<16x128xf32>
    %9 = arith.subf %5, %8 : vector<16x128xf32>
    %10 = math.exp %9 : vector<16x128xf32>
    %cst_6 = arith.constant dense<0.000000e+00> : vector<16xf32>
    %11 = vector.multi_reduction <add>, %10, %cst_6 [1] : vector<16x128xf32> to vector<16xf32>
    %12 = vector.shape_cast %11 : vector<16xf32> to vector<16x1xf32>
    %13 = math.log %12 : vector<16x1xf32>
    %14 = vector.broadcast %13 : vector<16x1xf32> to vector<16x128xf32>
    %15 = arith.subf %9, %14 : vector<16x128xf32>
    %c0_7 = arith.constant 0 : index
    %c0_8 = arith.constant 0 : index
    %16 = vector.load %arg4[%c0_7, %c0_8] : memref<16x128xf32, #tpu.memory_space<vmem>>, vector<16x128xf32>
    tpu.vector_store %arg4[%c0_7, %c0_8], %15 {strides = array<i32>} : memref<16x128xf32, #tpu.memory_space<vmem>>, vector<16x128xf32>,
    return
  }
  func.func @transform_0(%arg0: i32) -> (i32, i32) {
    %c0_i32 = arith.constant 0 : i32
    %c0_i32_0 = arith.constant 0 : i32
    return %arg0, %c0_i32 : i32, i32
  }
  func.func @transform_1(%arg0: i32) -> (i32, i32) {
    %c0_i32 = arith.constant 0 : i32
    %c0_i32_0 = arith.constant 0 : i32
    %c0_i32_1 = arith.constant 0 : i32
    return %c0_i32, %c0_i32_0 : i32, i32
  }
  func.func @transform_2(%arg0: i32) -> (i32, i32) {
    %c0_i32 = arith.constant 0 : i32
    %c0_i32_0 = arith.constant 0 : i32
    %c0_i32_1 = arith.constant 0 : i32
    return %c0_i32, %c0_i32_0 : i32, i32
  }
  func.func @transform_3(%arg0: i32) -> (i32, i32) {
    %c0_i32 = arith.constant 0 : i32
    %c0_i32_0 = arith.constant 0 : i32
    return %arg0, %c0_i32 : i32, i32
  }
}

</mosaic_0001>

<bundles_post_ra>
// kernel: projection_layer.1
= control target key start
LH: loop header
LB: loop body
LE: loop exit
PB: predicated region body
PF: predicated region fallthrough
CT: control target
= control target key end

     0   :  { %8 = vsyncpa [#allocation3], 0  ;;  %s390_s0 = inlined_call_operand.hbm [shape: f32[16,64], index: 0, kind: input, shape index: {}]   ;;  %s391_s1 = inlined_call_operand.hbm [shape: f32[64,128], index: 1, kind: input, shape index: {}]   ;;  %s392_s2 = inlined_call_operand.vmem [shape: f32[1,128], index: 2, kind: input, shape index: {}]   ;;  %s393_s3 = inlined_call_operand.hbm [shape: f32[16,128], index: 3, kind: output, shape index: {}]  }
   0x1   :  { %9 = vsyncpa [#allocation6], 0 }
   0x2   :  { %10 = vsyncpa [#allocation4], 0  ;;  %s315_s12 = smov [#allocation2]   ;;  %s243_s16 = scalar_lea.hbm %s390_s0, 256 }
   0x3   :  { %s16_s13 = sshll.u32 %s315_s12, 4  ;;  %p244_p0 = scmp.ne.s32.totalorder %s390_s0, %s243_s16  ;;  %s17_s13 = int_to_ptr.vmem [resolvable:$true] %s16_s13 }
   0x4   :  { %p247_p1 = scmp.lt.u32.totalorder %s243_s16, %s390_s0 }
   0x6   :  { %p249_p2 = pnand %p247_p1, %p244_p0 }
   0x8   :  { %252 = shalt.err (!%p249_p2)
}
   0x9   :  { %s253_s21 = scalar_lea.vmem %s17_s13, 256  ;;  %p258_p4 = scmp.lt.s32.totalorder %s17_s13, %s17_s13 }
   0xa   :  { %p254_p3 = scmp.ne.s32.totalorder %s17_s13, %s253_s21  ;;  %p259_p5 = scmp.lt.s32.totalorder %s253_s21, %s253_s21 }
   0xc   :  { %p260_p6 = por %p259_p5, %p258_p4 }
   0xe   :  { %p261_p7 = pnand %p260_p6, %p254_p3 }
  0x10   :  { %264 = shalt.err (!%p261_p7)
}
  0x11   :  { %s316_s22 = smov 128   ;;  %s317_s23 = smov 8  }
  0x12   :  { %22 = dma.hbm_to_vmem [thread:$0]  %s390_s0, 256, %s17_s13, [#allocation3], %s316_s22, %s316_s22, %s317_s23  }
  0x13   :  { %s318_s26 = smov [#allocation5]   ;;  %s265_s30 = scalar_lea.hbm %s391_s1, 1024 }
  0x14   :  { %s28_s27 = sshll.u32 %s318_s26, 4  ;;  %p266_p8 = scmp.ne.s32.totalorder %s391_s1, %s265_s30  ;;  %s29_s27 = int_to_ptr.vmem [resolvable:$true] %s28_s27 }
  0x15   :  { %p269_p9 = scmp.lt.u32.totalorder %s265_s30, %s391_s1 }
  0x17   :  { %p271_p10 = pnand %p269_p9, %p266_p8 }
  0x19   :  { %274 = shalt.err (!%p271_p10)
}
  0x1a   :  { %s275_s8 = scalar_lea.vmem %s29_s27, 1024  ;;  %p280_p12 = scmp.lt.s32.totalorder %s29_s27, %s29_s27 }
  0x1b   :  { %p276_p11 = scmp.ne.s32.totalorder %s29_s27, %s275_s8  ;;  %p281_p13 = scmp.lt.s32.totalorder %s275_s8, %s275_s8 }
  0x1d   :  { %p282_p0 = por %p281_p13, %p280_p12 }
  0x1f   :  { %p283_p1 = pnand %p282_p0, %p276_p11 }
  0x21   :  { %286 = shalt.err (!%p283_p1)
}
  0x22   :  { %34 = dma.hbm_to_vmem [thread:$0]  %s391_s1, 1024, %s29_s27, [#allocation6], %s316_s22, %s316_s22, %s317_s23  }
  0x23   :  { %309 = dma.done.wait [#allocation3], 256  }
  0x24   :  { %310 = vsyncadd [#allocation3], 4294967040 }
  0x25   :  { %311 = dma.done.wait [#allocation6], 1024  }
  0x26   :  { %312 = vsyncadd [#allocation6], 4294966272  ;;  %v45_v0 = vld [vmem:[#allocation5] sm:$0xff]  ;;  %v46_v1 = vld [vmem:[#allocation5 + $0x8] sm:$0xff]  ;;  %vm60_vm0 = vcmask 523264  }
  0x27   :  { %v47_v2 = vld [vmem:[#allocation5 + $0x10] sm:$0xff]  ;;  %v214_v3 = vpack.c.bf16 %v46_v1, %v45_v0  ;;  %v48_v4 = vld [vmem:[#allocation5 + $0x18] sm:$0xff]  ;;  %v49_v6 = vld [vmem:[#allocation5 + $0x20] sm:$0xff] }
  0x28   :  { %v218_v5 = vpack.c.bf16 %v48_v4, %v47_v2  ;;  %v50_v7 = vld [vmem:[#allocation5 + $0x28] sm:$0xff]  ;;  %v43_v8 = vld [vmem:[#allocation2] sm:$0xff]  ;;  %v52_v11 = vld [vmem:[#allocation5 + $0x38] sm:$0xff] }
  0x29   :  { %215 = vmatprep.subr.bf16.mxu0 %v214_v3  ;;  %211 = vmatprep.mubr.msk.f32.mxu0 %vm60_vm0, %v43_v8  ;;  %v222_v9 = vpack.c.bf16 %v50_v7, %v49_v6  ;;  %v51_v10 = vld [vmem:[#allocation5 + $0x30] sm:$0xff]  ;;  %v44_v13 = vld [vmem:[#allocation2 + $0x8] sm:$0xff] }
  0x2a   :  { %217 = vmatpush3.bf16.msra.mxu0 %v214_v3  ;;  %v226_v12 = vpack.c.bf16 %v52_v11, %v51_v10  ;;  %v182_v14 = vld [vmem:[%s392_s2] ss:$0 sm:$0xff]  ;;  %s319_s2 = smov [#allocation7]  }
  0x2b   :  { %219 = vmatprep.subr.bf16.mxu0 %v218_v5  ;;  %s169_s11 = sshll.u32 %s319_s2, 4  ;;  %s170_s11 = int_to_ptr.vmem [resolvable:$true] %s169_s11 }
  0x2c   :  { %s287_s12 = scalar_lea.vmem %s170_s11, 256  ;;  %p292_p3 = scmp.lt.s32.totalorder %s170_s11, %s170_s11 }
  0x2d   :  { %p288_p2 = scmp.ne.s32.totalorder %s170_s11, %s287_s12  ;;  %p293_p4 = scmp.lt.s32.totalorder %s287_s12, %s287_s12 }
  0x2e   :  { %221 = vmatpush3.bf16.msra.mxu0 %v218_v5 }
  0x2f   :  { %223 = vmatprep.subr.bf16.mxu0 %v222_v9  ;;  %p294_p5 = por %p293_p4, %p292_p3 }
  0x31   :  { %p295_p6 = pnand %p294_p5, %p288_p2 }
  0x32   :  { %225 = vmatpush3.bf16.msra.mxu0 %v222_v9 }
  0x33   :  { %227 = vmatprep.subr.bf16.mxu0 %v226_v12 }
  0x36   :  { %229 = vmatpush3.bf16.msra.mxu0 %v226_v12 }
  0x39   :  { %212 = vmatmul.mubr.msk.f32.vlgmr.msra.gmra.mrb[0].mxu0 %vm60_vm0, %v44_v13 }
 0x10c   :  { %v213_v15 = vpop.f32.mrb[0].mxu0 }
 0x10d   :  { %v133_v16 = vpop.f32.mrb[1].mxu0  ;;  %v139_v18 = vadd.f32 %v213_v15, %v182_v14 }
 0x10e   :  { %v134_v17 = vadd.f32 %v182_v14, %v133_v16 }
 0x110   :  { %142 = vmax.xlane.f32.xlu0 %v134_v17 }
 0x114   :  { %144 = vmax.xlane.f32.xlu0 %v139_v18 }
 0x19d   :  { %v143_v19 = vpop.xlane.xlu0 %142 }
 0x19e   :  { %v146_v20 = vsub.f32 %v134_v17, %v143_v19 }
 0x1a0   :  { %v148_v21 = vmul.f32 1.442695, %v146_v20 }
 0x1a1   :  { %v145_v22 = vpop.xlane.xlu0 %144 }
 0x1a2   :  { %v147_v23 = vsub.f32 %v139_v18, %v145_v22  ;;  %235 = vpow2.f32 %v148_v21 }
 0x1a4   :  { %v150_v24 = vmul.f32 1.442695, %v147_v23 }
 0x1a6   :  { %237 = vpow2.f32 %v150_v24 }
 0x1ac   :  { %v236_v25 = vpop.eup %235 }
 0x1ad   :  { %152 = vadd.xlane.f32.xlu1 %v236_v25 }
 0x1b0   :  { %v238_v26 = vpop.eup %237 }
 0x1b1   :  { %154 = vadd.xlane.f32.xlu1 %v238_v26 }
 0x23a   :  { %v153_v27 = vpop.xlane.xlu1 %152 }
 0x23b   :  { %239 = vlog2.f32 %v153_v27 }
 0x23e   :  { %v155_v28 = vpop.xlane.xlu1 %154 }
 0x23f   :  { %241 = vlog2.f32 %v155_v28 }
 0x245   :  { %v240_v29 = vpop.eup %239 }
 0x246   :  { %v157_v30 = vmul.f32 0.6931472, %v240_v29 }
 0x248   :  { %v160_v31 = vsub.f32 %v146_v20, %v157_v30 }
 0x249   :  { %v242_v32 = vpop.eup %241 }
 0x24a   :  { %162 = vst [vmem:[#allocation7] sm:$0xff] %v160_v31  ;;  %v159_v33 = vmul.f32 0.6931472, %v242_v32 }
 0x24c   :  { %v161_v34 = vsub.f32 %v147_v23, %v159_v33 }
 0x24e   :  { %163 = vst [vmem:[#allocation7 + $0x8] sm:$0xff] %v161_v34 }
 0x24f   :  { %298 = shalt.err (!%p295_p6)
}
 0x250   :  { %s299_s15 = scalar_lea.hbm %s393_s3, 256 }
 0x251   :  { %p300_p7 = scmp.ne.s32.totalorder %s393_s3, %s299_s15  ;;  %p303_p8 = scmp.lt.u32.totalorder %s299_s15, %s393_s3 }
 0x253   :  { %p305_p9 = pnand %p303_p8, %p300_p7 }
 0x255   :  { %308 = shalt.err (!%p305_p9)
}
 0x256   :  { %175 = dma.vmem_to_hbm [thread:$0]  %s170_s11, 256, %s393_s3, [#allocation4], %s316_s22, %s316_s22, %s317_s23  }
 0x257   :  { %313 = dma.done.wait [#allocation4], 256  }
 0x258   :  { %314 = vsyncadd [#allocation4], 4294967040 }
 0x259   :  { %179 = vsyncpa [#allocation3], 1 }
 0x25a   :  { %180 = vsyncpa [#allocation6], 1 }
 0x25b   :  { %181 = vsyncpa [#allocation4], 1 }

</bundles_post_ra>
